<compile_context>
chip_gen: v5e
topology: v5e:2x2
jax: 0.10.0
libtpu: 0.0.40
codegen_flags: <defaults>
</compile_context>

<pallas_src>
import functools
import numpy as np
import jax
import jax.numpy as jnp
from jax import lax
from jax.experimental import pallas as pl
from jax.experimental.pallas import tpu as pltpu

GAMMA = 1.0  # loss_type='ExpGAUC', gamma=1


def _gauc_w_kernel(ags_ref, omas_ref, dh_ref, apos_ref, t_ref, *, block_q, num_nodes):
    """One q-block: T[q, :] = sum_p W[p, q] * Apos[p, :].

    ags_ref  : [Mp, K]        A * g_sub            (resident, fetched once)
    omas_ref : [Bq, K]        (1 - As) rows of this q-block (streamed)
    dh_ref   : [1, Mp, Bq]    dh[p, r] = 0.5 / (1 + vi_inter[p, q0 + r]) (streamed)
    apos_ref : [Mp, C]        Y * exp(-g*pred) / N_i (resident)
    t_ref    : [Bq, C]        output rows of T for this q-block
    """
    half_k = 0.5 * float(num_nodes)
    dh_blk = dh_ref[0]                                   # [Mp, Bq]
    # Static unroll over the Bq rows of the block (Bq is small; the grid step boundary
    # bounds live ranges — no unroll=True over the full M).
    for r in range(block_q):
        w_q = omas_ref[r:r + 1, :]                       # [1, K]   (1 - As[q, :])
        dh_q = dh_blk[:, r:r + 1]                        # [Mp, 1]  static lane slice
        # sum_k sigmoid(-arg) == 0.5*K - 0.5*sum_k tanh(arg/2): single EUP op / element.
        th = jnp.tanh((1.0 + ags_ref[...] * w_q) * dh_q)            # [Mp, K]
        col = half_k - 0.5 * jnp.sum(th, axis=1, keepdims=True)     # [Mp, 1] == W[:, q]
        t_ref[r:r + 1, :] = jnp.sum(col * apos_ref[...], axis=0, keepdims=True)


@functools.partial(jax.jit, static_argnames=("num_classes", "gamma", "block_q"))
def gauc_loss(pred, target, mask, adj, adj_self, gem,
              w_sub, w_inter, w_global, num_classes, gamma=GAMMA, block_q=8):
    del w_global  # feeds vg_i in the torch forward, which never reaches the returned loss
    f32 = jnp.float32
    pred = pred.astype(f32)
    M = pred.shape[0]
    C = num_classes
    K = adj.shape[-1]

    # ---- tiny projections in XLA (removes gem from kernel VMEM; one stacked matvec) ----
    # (GEM @ W.T).sum(-1) == GEM @ W.sum(0)
    ws = jnp.stack([jnp.sum(w_sub.astype(f32), axis=0),
                    jnp.sum(w_inter.astype(f32), axis=0)], axis=1)     # [F, 2]
    proj = jnp.dot(gem.astype(f32), ws)                                # [K, 2]
    gsub, ginter = proj[:, 0], proj[:, 1]

    # Contract (same as the torch module): pred/target rows correspond 1:1 with the True
    # entries of `mask` (mask.sum() == M); nonzero(size=M) would pad with row 0 otherwise.
    Y = jax.nn.one_hot(target, C, dtype=f32)                           # [M, C]
    mask_idx = jnp.nonzero(mask, size=M)[0]
    A = adj[mask_idx].astype(f32)                                      # [M, K]
    As = adj_self[mask_idx].astype(f32)                                # [M, K]
    # TODO(synk): for very large graphs, gather adj rows inside the kernel via scalar-
    # prefetched mask_idx + pl.Element specs (and bf16/int8 adjacency) instead of
    # materializing gathered f32 copies in HBM, and add a K-tiling grid axis.

    Ags = A * gsub[None, :]                                            # [M, K]
    OmAs = 1.0 - As                                                    # [M, K] (hoisted)
    vi_inter = jnp.dot(A * ginter[None, :], A.T)                       # [M, M] (MXU, XLA)
    dhalf = 0.5 / (1.0 + vi_inter)                                     # [M, M] 0.5 folded in

    N = jnp.sum(Y, axis=0)                                             # [C]
    invN = jnp.where(N > 0.0, 1.0 / jnp.maximum(N, 1.0), 0.0)          # empty classes -> 0
    E = jnp.exp(gamma * pred)                                          # [M, C] exp(+g pred[q,i])
    Apos = Y * jnp.exp(-gamma * pred) * invN[None, :]                  # [M, C]
    Yneg = Y * invN[None, :]                                           # [M, C]

    # ---- pad node axes to a multiple of block_q (padded rows contribute exactly 0) -----
    Mp = pl.cdiv(M, block_q) * block_q
    pad = Mp - M
    if pad:
        Ags = jnp.pad(Ags, ((0, pad), (0, 0)))
        OmAs = jnp.pad(OmAs, ((0, pad), (0, 0)))
        Apos = jnp.pad(Apos, ((0, pad), (0, 0)))
        dhalf = jnp.pad(dhalf, ((0, pad), (0, pad)))

    # q-block-major column layout: D3[b, p, r] = dhalf[p, b*block_q + r], so the kernel
    # reads the per-q column with a static lane slice (no dynamic lane indexing).
    D3 = jnp.transpose(dhalf).reshape(Mp // block_q, block_q, Mp).transpose(0, 2, 1)

    kernel = functools.partial(_gauc_w_kernel, block_q=block_q, num_nodes=K)
    T = pl.pallas_call(
        kernel,
        grid=(Mp // block_q,),
        in_specs=[
            pl.BlockSpec((Mp, K), lambda b: (0, 0)),              # Ags  : resident
            pl.BlockSpec((block_q, K), lambda b: (b, 0)),         # OmAs : streamed rows
            pl.BlockSpec((1, Mp, block_q), lambda b: (b, 0, 0)),  # dhalf: streamed columns
            pl.BlockSpec((Mp, C), lambda b: (0, 0)),              # Apos : resident
        ],
        out_specs=pl.BlockSpec((block_q, C), lambda b: (b, 0)),
        out_shape=jax.ShapeDtypeStruct((Mp, C), f32),
        compiler_params=pltpu.CompilerParams(
            dimension_semantics=("parallel",),        # q-blocks shard across TCs on v7x
            vmem_limit_bytes=56 * 1024 * 1024,        # <= v7x 64 MiB physical VMEM
        ),
        # TODO(synk): on v6e/v7x the elementwise/tanh path can run in packed bf16 for ~2x
        # VPU/EUP throughput (keep the K-reduction and the final sums in f32); kept f32
        # here so the same kernel lowers cleanly on v5e.
    )(Ags, OmAs, D3, Apos)
    T = T[:M]                                                          # drop padded q rows

    # ---- all (i, j) class pairs at once via exp(-g(a-b)) = exp(-g a) exp(g b) ----------
    hi = lax.Precision.HIGHEST  # tiny [M,C]x[M,C] contraction: protect the final loss sum
    contrib = jnp.dot(jnp.transpose(T * E), Yneg, precision=hi)        # [C, C]
    loss = jnp.sum(contrib) - jnp.trace(contrib)                       # skip i == j
    return loss.reshape(1)                                             # torch returns shape (1,)


# ---------------------------- numpy reference (eager) ------------------------
def _reference_loss(pred, target, A, As, gem, w_sub, w_inter, C, gamma):
    gsub = (gem @ w_sub.T).sum(-1)
    ginter = (gem @ w_inter.T).sum(-1)
    Y = np.stack([(target == c).astype(np.float32) for c in range(C)], 1)
    N = Y.sum(0)
    loss = 0.0
    for i in range(C):
        for j in range(C):
            if i == j:
                continue
            pos = Y[:, i].astype(bool)
            neg = Y[:, j].astype(bool)
            ppos = pred[pos, i]
            pneg = pred[neg, i]
            ij = np.exp(-gamma * (ppos[:, None] - pneg[None, :]))
            Ap, An, Ans = A[pos], A[neg], As[neg]
            vi_inter = (Ap * ginter) @ An.T
            sub = Ap[:, None, :] * (1.0 - Ans)[None, :, :] * gsub
            vl = 1.0 / (1.0 + np.exp(-((1.0 + sub) / (1.0 + vi_inter[:, :, None]))))
            v = 1.0 - vl
            loss += (1.0 / (N[i] * N[j]) * v * ij[:, :, None]).sum()
    return loss


if __name__ == "__main__":
    key = jax.random.PRNGKey(0)
    C = 3            # num_classes
    K = 128          # num_nodes
    F = 32           # global_effect_matrix feature dim
    D = 64           # weight_sub_dim = weight_inter_dim = weight_global_dim (defaults)
    M = 16           # number of train-mask nodes

    k1, k2, k3, k4, k5, k6, k7 = jax.random.split(key, 7)

    adj = jax.random.bernoulli(k1, 0.2, (K, K))
    adj = jnp.logical_or(adj, adj.T)
    eye = jnp.eye(K, dtype=bool)
    # adj_self = (adj ^ diag(adj)) | I  -> adj with diagonal forced True
    adj_self = jnp.logical_or(jnp.logical_and(adj, jnp.logical_not(eye)), eye)

    perm = np.asarray(jax.random.permutation(k2, K))
    mask_np = np.zeros((K,), dtype=bool)
    mask_idx_np = np.sort(perm[:M])
    mask_np[mask_idx_np] = True
    mask = jnp.asarray(mask_np)

    target = jnp.asarray(np.arange(M) % C, dtype=jnp.int32)   # every class present
    pred = jax.random.normal(k3, (M, C), dtype=jnp.float32)

    gem = jax.random.uniform(k4, (K, F), dtype=jnp.float32) * 0.01
    # nn.init.uniform_(w, 0, 1) for the three bias-free Linear layers
    w_sub = jax.random.uniform(k5, (D, F), dtype=jnp.float32)
    w_inter = jax.random.uniform(k6, (D, F), dtype=jnp.float32)
    w_global = jax.random.uniform(k7, (D, F), dtype=jnp.float32)

    loss = gauc_loss(pred, target, mask, adj, adj_self, gem,
                     w_sub, w_inter, w_global, num_classes=C, gamma=GAMMA)
    loss = jax.block_until_ready(loss)

    ref = _reference_loss(
        np.asarray(pred), np.asarray(target),
        np.asarray(adj)[mask_idx_np].astype(np.float32),
        np.asarray(adj_self)[mask_idx_np].astype(np.float32),
        np.asarray(gem), np.asarray(w_sub), np.asarray(w_inter),
        C, GAMMA)

    assert np.allclose(np.asarray(loss)[0], ref, rtol=2e-3, atol=1e-2), (loss, ref)
    print("KERNEL_OK")
</pallas_src>

<mosaic_0001>
module attributes {stable_mosaic.version = 11 : i64} {
  func.func @_gauc_w_kernel(%arg0: i32, %arg1: memref<16x128xf32, #tpu.memory_space<vmem>>, %arg2: memref<8x128xf32, #tpu.memory_space<vmem>>, %arg3: memref<1x16x8xf32, #tpu.memory_space<vmem>>, %arg4: memref<16x3xf32, #tpu.memory_space<vmem>>, %arg5: memref<8x3xf32, #tpu.memory_space<vmem>>) attributes {dimension_semantics = [#tpu.dimension_semantics<parallel>], iteration_bounds = array<i64: 2>, scalar_prefetch = 0 : i64, scratch_operands = 0 : i64, tpu.core_type = #tpu.core_type<tc>, window_params = [{pipeline_mode = #tpu.pipeline_mode<synchronous>, transform_indices = @transform_0, window_bounds = array<i64: 16, 128>}, {transform_indices = @transform_1, window_bounds = array<i64: 8, 128>}, {transform_indices = @transform_2, window_bounds = array<i64: 1, 16, 8>}, {pipeline_mode = #tpu.pipeline_mode<synchronous>, transform_indices = @transform_3, window_bounds = array<i64: 16, 3>}, {transform_indices = @transform_4, window_bounds = array<i64: 8, 3>}]} {
    %c0 = arith.constant 0 : index
    %c0_0 = arith.constant 0 : index
    %c0_1 = arith.constant 0 : index
    %0 = vector.load %arg3[%c0, %c0_0, %c0_1] : memref<1x16x8xf32, #tpu.memory_space<vmem>>, vector<1x16x8xf32>
    %1 = vector.shape_cast %0 : vector<1x16x8xf32> to vector<16x8xf32>
    %c0_2 = arith.constant 0 : index
    %c0_3 = arith.constant 0 : index
    %2 = vector.load %arg2[%c0_2, %c0_3] : memref<8x128xf32, #tpu.memory_space<vmem>>, vector<1x128xf32>
    %3 = vector.extract_strided_slice %1 {offsets = [0, 0], sizes = [16, 1], strides = [1, 1]} : vector<16x8xf32> to vector<16x1xf32>
    %c0_4 = arith.constant 0 : index
    %c0_5 = arith.constant 0 : index
    %4 = vector.load %arg1[%c0_4, %c0_5] : memref<16x128xf32, #tpu.memory_space<vmem>>, vector<16x128xf32>
    %5 = vector.broadcast %2 : vector<1x128xf32> to vector<16x128xf32>
    %6 = arith.mulf %4, %5 : vector<16x128xf32>
    %cst = arith.constant 1.000000e+00 : f32
    %7 = vector.broadcast %cst : f32 to vector<16x128xf32>
    %8 = arith.addf %7, %6 : vector<16x128xf32>
    %9 = vector.broadcast %3 : vector<16x1xf32> to vector<16x128xf32>
    %10 = arith.mulf %8, %9 : vector<16x128xf32>
    %11 = math.tanh %10 : vector<16x128xf32>
    %cst_6 = arith.constant dense<0.000000e+00> : vector<16xf32>
    %12 = vector.multi_reduction <add>, %11, %cst_6 [1] : vector<16x128xf32> to vector<16xf32>
    %13 = vector.shape_cast %12 : vector<16xf32> to vector<16x1xf32>
    %cst_7 = arith.constant 5.000000e-01 : f32
    %14 = vector.broadcast %cst_7 : f32 to vector<16x1xf32>
    %15 = arith.mulf %14, %13 : vector<16x1xf32>
    %cst_8 = arith.constant 6.400000e+01 : f32
    %16 = vector.broadcast %cst_8 : f32 to vector<16x1xf32>
    %17 = arith.subf %16, %15 : vector<16x1xf32>
    %c0_9 = arith.constant 0 : index
    %c0_10 = arith.constant 0 : index
    %18 = vector.load %arg4[%c0_9, %c0_10] : memref<16x3xf32, #tpu.memory_space<vmem>>, vector<16x3xf32>
    %19 = vector.broadcast %17 : vector<16x1xf32> to vector<16x3xf32>
    %20 = arith.mulf %19, %18 : vector<16x3xf32>
    %cst_11 = arith.constant dense<0.000000e+00> : vector<3xf32>
    %21 = vector.multi_reduction <add>, %20, %cst_11 [0] : vector<16x3xf32> to vector<3xf32>
    %22 = vector.shape_cast %21 : vector<3xf32> to vector<1x3xf32>
    %c0_12 = arith.constant 0 : index
    %c0_13 = arith.constant 0 : index
    %23 = vector.load %arg5[%c0_12, %c0_13] : memref<8x3xf32, #tpu.memory_space<vmem>>, vector<1x3xf32>
    tpu.vector_store %arg5[%c0_12, %c0_13], %22 {strides = array<i32>} : memref<8x3xf32, #tpu.memory_space<vmem>>, vector<1x3xf32>,
    %c1 = arith.constant 1 : index
    %c0_14 = arith.constant 0 : index
    %24 = vector.load %arg2[%c1, %c0_14] : memref<8x128xf32, #tpu.memory_space<vmem>>, vector<1x128xf32>
    %25 = vector.extract_strided_slice %1 {offsets = [0, 1], sizes = [16, 1], strides = [1, 1]} : vector<16x8xf32> to vector<16x1xf32>
    %c0_15 = arith.constant 0 : index
    %c0_16 = arith.constant 0 : index
    %26 = vector.load %arg1[%c0_15, %c0_16] : memref<16x128xf32, #tpu.memory_space<vmem>>, vector<16x128xf32>
    %27 = vector.broadcast %24 : vector<1x128xf32> to vector<16x128xf32>
    %28 = arith.mulf %26, %27 : vector<16x128xf32>
    %cst_17 = arith.constant 1.000000e+00 : f32
    %29 = vector.broadcast %cst_17 : f32 to vector<16x128xf32>
    %30 = arith.addf %29, %28 : vector<16x128xf32>
    %31 = vector.broadcast %25 : vector<16x1xf32> to vector<16x128xf32>
    %32 = arith.mulf %30, %31 : vector<16x128xf32>
    %33 = math.tanh %32 : vector<16x128xf32>
    %cst_18 = arith.constant dense<0.000000e+00> : vector<16xf32>
    %34 = vector.multi_reduction <add>, %33, %cst_18 [1] : vector<16x128xf32> to vector<16xf32>
    %35 = vector.shape_cast %34 : vector<16xf32> to vector<16x1xf32>
    %cst_19 = arith.constant 5.000000e-01 : f32
    %36 = vector.broadcast %cst_19 : f32 to vector<16x1xf32>
    %37 = arith.mulf %36, %35 : vector<16x1xf32>
    %cst_20 = arith.constant 6.400000e+01 : f32
    %38 = vector.broadcast %cst_20 : f32 to vector<16x1xf32>
    %39 = arith.subf %38, %37 : vector<16x1xf32>
    %c0_21 = arith.constant 0 : index
    %c0_22 = arith.constant 0 : index
    %40 = vector.load %arg4[%c0_21, %c0_22] : memref<16x3xf32, #tpu.memory_space<vmem>>, vector<16x3xf32>
    %41 = vector.broadcast %39 : vector<16x1xf32> to vector<16x3xf32>
    %42 = arith.mulf %41, %40 : vector<16x3xf32>
    %cst_23 = arith.constant dense<0.000000e+00> : vector<3xf32>
    %43 = vector.multi_reduction <add>, %42, %cst_23 [0] : vector<16x3xf32> to vector<3xf32>
    %44 = vector.shape_cast %43 : vector<3xf32> to vector<1x3xf32>
    %c1_24 = arith.constant 1 : index
    %c0_25 = arith.constant 0 : index
    %45 = vector.load %arg5[%c1_24, %c0_25] : memref<8x3xf32, #tpu.memory_space<vmem>>, vector<1x3xf32>
    tpu.vector_store %arg5[%c1_24, %c0_25], %44 {strides = array<i32>} : memref<8x3xf32, #tpu.memory_space<vmem>>, vector<1x3xf32>,
    %c2 = arith.constant 2 : index
    %c0_26 = arith.constant 0 : index
    %46 = vector.load %arg2[%c2, %c0_26] : memref<8x128xf32, #tpu.memory_space<vmem>>, vector<1x128xf32>
    %47 = vector.extract_strided_slice %1 {offsets = [0, 2], sizes = [16, 1], strides = [1, 1]} : vector<16x8xf32> to vector<16x1xf32>
    %c0_27 = arith.constant 0 : index
    %c0_28 = arith.constant 0 : index
    %48 = vector.load %arg1[%c0_27, %c0_28] : memref<16x128xf32, #tpu.memory_space<vmem>>, vector<16x128xf32>
    %49 = vector.broadcast %46 : vector<1x128xf32> to vector<16x128xf32>
    %50 = arith.mulf %48, %49 : vector<16x128xf32>
    %cst_29 = arith.constant 1.000000e+00 : f32
    %51 = vector.broadcast %cst_29 : f32 to vector<16x128xf32>
    %52 = arith.addf %51, %50 : vector<16x128xf32>
    %53 = vector.broadcast %47 : vector<16x1xf32> to vector<16x128xf32>
    %54 = arith.mulf %52, %53 : vector<16x128xf32>
    %55 = math.tanh %54 : vector<16x128xf32>
    %cst_30 = arith.constant dense<0.000000e+00> : vector<16xf32>
    %56 = vector.multi_reduction <add>, %55, %cst_30 [1] : vector<16x128xf32> to vector<16xf32>
    %57 = vector.shape_cast %56 : vector<16xf32> to vector<16x1xf32>
    %cst_31 = arith.constant 5.000000e-01 : f32
    %58 = vector.broadcast %cst_31 : f32 to vector<16x1xf32>
    %59 = arith.mulf %58, %57 : vector<16x1xf32>
    %cst_32 = arith.constant 6.400000e+01 : f32
    %60 = vector.broadcast %cst_32 : f32 to vector<16x1xf32>
    %61 = arith.subf %60, %59 : vector<16x1xf32>
    %c0_33 = arith.constant 0 : index
    %c0_34 = arith.constant 0 : index
    %62 = vector.load %arg4[%c0_33, %c0_34] : memref<16x3xf32, #tpu.memory_space<vmem>>, vector<16x3xf32>
    %63 = vector.broadcast %61 : vector<16x1xf32> to vector<16x3xf32>
    %64 = arith.mulf %63, %62 : vector<16x3xf32>
    %cst_35 = arith.constant dense<0.000000e+00> : vector<3xf32>
    %65 = vector.multi_reduction <add>, %64, %cst_35 [0] : vector<16x3xf32> to vector<3xf32>
    %66 = vector.shape_cast %65 : vector<3xf32> to vector<1x3xf32>
    %c2_36 = arith.constant 2 : index
    %c0_37 = arith.constant 0 : index
    %67 = vector.load %arg5[%c2_36, %c0_37] : memref<8x3xf32, #tpu.memory_space<vmem>>, vector<1x3xf32>
    tpu.vector_store %arg5[%c2_36, %c0_37], %66 {strides = array<i32>} : memref<8x3xf32, #tpu.memory_space<vmem>>, vector<1x3xf32>,
    %c3 = arith.constant 3 : index
    %c0_38 = arith.constant 0 : index
    %68 = vector.load %arg2[%c3, %c0_38] : memref<8x128xf32, #tpu.memory_space<vmem>>, vector<1x128xf32>
    %69 = vector.extract_strided_slice %1 {offsets = [0, 3], sizes = [16, 1], strides = [1, 1]} : vector<16x8xf32> to vector<16x1xf32>
    %c0_39 = arith.constant 0 : index
    %c0_40 = arith.constant 0 : index
    %70 = vector.load %arg1[%c0_39, %c0_40] : memref<16x128xf32, #tpu.memory_space<vmem>>, vector<16x128xf32>
    %71 = vector.broadcast %68 : vector<1x128xf32> to vector<16x128xf32>
    %72 = arith.mulf %70, %71 : vector<16x128xf32>
    %cst_41 = arith.constant 1.000000e+00 : f32
    %73 = vector.broadcast %cst_41 : f32 to vector<16x128xf32>
    %74 = arith.addf %73, %72 : vector<16x128xf32>
    %75 = vector.broadcast %69 : vector<16x1xf32> to vector<16x128xf32>
    %76 = arith.mulf %74, %75 : vector<16x128xf32>
    %77 = math.tanh %76 : vector<16x128xf32>
    %cst_42 = arith.constant dense<0.000000e+00> : vector<16xf32>
    %78 = vector.multi_reduction <add>, %77, %cst_42 [1] : vector<16x128xf32> to vector<16xf32>
    %79 = vector.shape_cast %78 : vector<16xf32> to vector<16x1xf32>
    %cst_43 = arith.constant 5.000000e-01 : f32
    %80 = vector.broadcast %cst_43 : f32 to vector<16x1xf32>
    %81 = arith.mulf %80, %79 : vector<16x1xf32>
    %cst_44 = arith.constant 6.400000e+01 : f32
    %82 = vector.broadcast %cst_44 : f32 to vector<16x1xf32>
    %83 = arith.subf %82, %81 : vector<16x1xf32>
    %c0_45 = arith.constant 0 : index
    %c0_46 = arith.constant 0 : index
    %84 = vector.load %arg4[%c0_45, %c0_46] : memref<16x3xf32, #tpu.memory_space<vmem>>, vector<16x3xf32>
    %85 = vector.broadcast %83 : vector<16x1xf32> to vector<16x3xf32>
    %86 = arith.mulf %85, %84 : vector<16x3xf32>
    %cst_47 = arith.constant dense<0.000000e+00> : vector<3xf32>
    %87 = vector.multi_reduction <add>, %86, %cst_47 [0] : vector<16x3xf32> to vector<3xf32>
    %88 = vector.shape_cast %87 : vector<3xf32> to vector<1x3xf32>
    %c3_48 = arith.constant 3 : index
    %c0_49 = arith.constant 0 : index
    %89 = vector.load %arg5[%c3_48, %c0_49] : memref<8x3xf32, #tpu.memory_space<vmem>>, vector<1x3xf32>
    tpu.vector_store %arg5[%c3_48, %c0_49], %88 {strides = array<i32>} : memref<8x3xf32, #tpu.memory_space<vmem>>, vector<1x3xf32>,
    %c4 = arith.constant 4 : index
    %c0_50 = arith.constant 0 : index
    %90 = vector.load %arg2[%c4, %c0_50] : memref<8x128xf32, #tpu.memory_space<vmem>>, vector<1x128xf32>
    %91 = vector.extract_strided_slice %1 {offsets = [0, 4], sizes = [16, 1], strides = [1, 1]} : vector<16x8xf32> to vector<16x1xf32>
    %c0_51 = arith.constant 0 : index
    %c0_52 = arith.constant 0 : index
    %92 = vector.load %arg1[%c0_51, %c0_52] : memref<16x128xf32, #tpu.memory_space<vmem>>, vector<16x128xf32>
    %93 = vector.broadcast %90 : vector<1x128xf32> to vector<16x128xf32>
    %94 = arith.mulf %92, %93 : vector<16x128xf32>
    %cst_53 = arith.constant 1.000000e+00 : f32
    %95 = vector.broadcast %cst_53 : f32 to vector<16x128xf32>
    %96 = arith.addf %95, %94 : vector<16x128xf32>
    %97 = vector.broadcast %91 : vector<16x1xf32> to vector<16x128xf32>
    %98 = arith.mulf %96, %97 : vector<16x128xf32>
    %99 = math.tanh %98 : vector<16x128xf32>
    %cst_54 = arith.constant dense<0.000000e+00> : vector<16xf32>
    %100 = vector.multi_reduction <add>, %99, %cst_54 [1] : vector<16x128xf32> to vector<16xf32>
    %101 = vector.shape_cast %100 : vector<16xf32> to vector<16x1xf32>
    %cst_55 = arith.constant 5.000000e-01 : f32
    %102 = vector.broadcast %cst_55 : f32 to vector<16x1xf32>
    %103 = arith.mulf %102, %101 : vector<16x1xf32>
    %cst_56 = arith.constant 6.400000e+01 : f32
    %104 = vector.broadcast %cst_56 : f32 to vector<16x1xf32>
    %105 = arith.subf %104, %103 : vector<16x1xf32>
    %c0_57 = arith.constant 0 : index
    %c0_58 = arith.constant 0 : index
    %106 = vector.load %arg4[%c0_57, %c0_58] : memref<16x3xf32, #tpu.memory_space<vmem>>, vector<16x3xf32>
    %107 = vector.broadcast %105 : vector<16x1xf32> to vector<16x3xf32>
    %108 = arith.mulf %107, %106 : vector<16x3xf32>
    %cst_59 = arith.constant dense<0.000000e+00> : vector<3xf32>
    %109 = vector.multi_reduction <add>, %108, %cst_59 [0] : vector<16x3xf32> to vector<3xf32>
    %110 = vector.shape_cast %109 : vector<3xf32> to vector<1x3xf32>
    %c4_60 = arith.constant 4 : index
    %c0_61 = arith.constant 0 : index
    %111 = vector.load %arg5[%c4_60, %c0_61] : memref<8x3xf32, #tpu.memory_space<vmem>>, vector<1x3xf32>
    tpu.vector_store %arg5[%c4_60, %c0_61], %110 {strides = array<i32>} : memref<8x3xf32, #tpu.memory_space<vmem>>, vector<1x3xf32>,
    %c5 = arith.constant 5 : index
    %c0_62 = arith.constant 0 : index
    %112 = vector.load %arg2[%c5, %c0_62] : memref<8x128xf32, #tpu.memory_space<vmem>>, vector<1x128xf32>
    %113 = vector.extract_strided_slice %1 {offsets = [0, 5], sizes = [16, 1], strides = [1, 1]} : vector<16x8xf32> to vector<16x1xf32>
    %c0_63 = arith.constant 0 : index
    %c0_64 = arith.constant 0 : index
    %114 = vector.load %arg1[%c0_63, %c0_64] : memref<16x128xf32, #tpu.memory_space<vmem>>, vector<16x128xf32>
    %115 = vector.broadcast %112 : vector<1x128xf32> to vector<16x128xf32>
    %116 = arith.mulf %114, %115 : vector<16x128xf32>
    %cst_65 = arith.constant 1.000000e+00 : f32
    %117 = vector.broadcast %cst_65 : f32 to vector<16x128xf32>
    %118 = arith.addf %117, %116 : vector<16x128xf32>
    %119 = vector.broadcast %113 : vector<16x1xf32> to vector<16x128xf32>
    %120 = arith.mulf %118, %119 : vector<16x128xf32>
    %121 = math.tanh %120 : vector<16x128xf32>
    %cst_66 = arith.constant dense<0.000000e+00> : vector<16xf32>
    %122 = vector.multi_reduction <add>, %121, %cst_66 [1] : vector<16x128xf32> to vector<16xf32>
    %123 = vector.shape_cast %122 : vector<16xf32> to vector<16x1xf32>
    %cst_67 = arith.constant 5.000000e-01 : f32
    %124 = vector.broadcast %cst_67 : f32 to vector<16x1xf32>
    %125 = arith.mulf %124, %123 : vector<16x1xf32>
    %cst_68 = arith.constant 6.400000e+01 : f32
    %126 = vector.broadcast %cst_68 : f32 to vector<16x1xf32>
    %127 = arith.subf %126, %125 : vector<16x1xf32>
    %c0_69 = arith.constant 0 : index
    %c0_70 = arith.constant 0 : index
    %128 = vector.load %arg4[%c0_69, %c0_70] : memref<16x3xf32, #tpu.memory_space<vmem>>, vector<16x3xf32>
    %129 = vector.broadcast %127 : vector<16x1xf32> to vector<16x3xf32>
    %130 = arith.mulf %129, %128 : vector<16x3xf32>
    %cst_71 = arith.constant dense<0.000000e+00> : vector<3xf32>
    %131 = vector.multi_reduction <add>, %130, %cst_71 [0] : vector<16x3xf32> to vector<3xf32>
    %132 = vector.shape_cast %131 : vector<3xf32> to vector<1x3xf32>
    %c5_72 = arith.constant 5 : index
    %c0_73 = arith.constant 0 : index
    %133 = vector.load %arg5[%c5_72, %c0_73] : memref<8x3xf32, #tpu.memory_space<vmem>>, vector<1x3xf32>
    tpu.vector_store %arg5[%c5_72, %c0_73], %132 {strides = array<i32>} : memref<8x3xf32, #tpu.memory_space<vmem>>, vector<1x3xf32>,
    %c6 = arith.constant 6 : index
    %c0_74 = arith.constant 0 : index
    %134 = vector.load %arg2[%c6, %c0_74] : memref<8x128xf32, #tpu.memory_space<vmem>>, vector<1x128xf32>
    %135 = vector.extract_strided_slice %1 {offsets = [0, 6], sizes = [16, 1], strides = [1, 1]} : vector<16x8xf32> to vector<16x1xf32>
    %c0_75 = arith.constant 0 : index
    %c0_76 = arith.constant 0 : index
    %136 = vector.load %arg1[%c0_75, %c0_76] : memref<16x128xf32, #tpu.memory_space<vmem>>, vector<16x128xf32>
    %137 = vector.broadcast %134 : vector<1x128xf32> to vector<16x128xf32>
    %138 = arith.mulf %136, %137 : vector<16x128xf32>
    %cst_77 = arith.constant 1.000000e+00 : f32
    %139 = vector.broadcast %cst_77 : f32 to vector<16x128xf32>
    %140 = arith.addf %139, %138 : vector<16x128xf32>
    %141 = vector.broadcast %135 : vector<16x1xf32> to vector<16x128xf32>
    %142 = arith.mulf %140, %141 : vector<16x128xf32>
    %143 = math.tanh %142 : vector<16x128xf32>
    %cst_78 = arith.constant dense<0.000000e+00> : vector<16xf32>
    %144 = vector.multi_reduction <add>, %143, %cst_78 [1] : vector<16x128xf32> to vector<16xf32>
    %145 = vector.shape_cast %144 : vector<16xf32> to vector<16x1xf32>
    %cst_79 = arith.constant 5.000000e-01 : f32
    %146 = vector.broadcast %cst_79 : f32 to vector<16x1xf32>
    %147 = arith.mulf %146, %145 : vector<16x1xf32>
    %cst_80 = arith.constant 6.400000e+01 : f32
    %148 = vector.broadcast %cst_80 : f32 to vector<16x1xf32>
    %149 = arith.subf %148, %147 : vector<16x1xf32>
    %c0_81 = arith.constant 0 : index
    %c0_82 = arith.constant 0 : index
    %150 = vector.load %arg4[%c0_81, %c0_82] : memref<16x3xf32, #tpu.memory_space<vmem>>, vector<16x3xf32>
    %151 = vector.broadcast %149 : vector<16x1xf32> to vector<16x3xf32>
    %152 = arith.mulf %151, %150 : vector<16x3xf32>
    %cst_83 = arith.constant dense<0.000000e+00> : vector<3xf32>
    %153 = vector.multi_reduction <add>, %152, %cst_83 [0] : vector<16x3xf32> to vector<3xf32>
    %154 = vector.shape_cast %153 : vector<3xf32> to vector<1x3xf32>
    %c6_84 = arith.constant 6 : index
    %c0_85 = arith.constant 0 : index
    %155 = vector.load %arg5[%c6_84, %c0_85] : memref<8x3xf32, #tpu.memory_space<vmem>>, vector<1x3xf32>
    tpu.vector_store %arg5[%c6_84, %c0_85], %154 {strides = array<i32>} : memref<8x3xf32, #tpu.memory_space<vmem>>, vector<1x3xf32>,
    %c7 = arith.constant 7 : index
    %c0_86 = arith.constant 0 : index
    %156 = vector.load %arg2[%c7, %c0_86] : memref<8x128xf32, #tpu.memory_space<vmem>>, vector<1x128xf32>
    %157 = vector.extract_strided_slice %1 {offsets = [0, 7], sizes = [16, 1], strides = [1, 1]} : vector<16x8xf32> to vector<16x1xf32>
    %c0_87 = arith.constant 0 : index
    %c0_88 = arith.constant 0 : index
    %158 = vector.load %arg1[%c0_87, %c0_88] : memref<16x128xf32, #tpu.memory_space<vmem>>, vector<16x128xf32>
    %159 = vector.broadcast %156 : vector<1x128xf32> to vector<16x128xf32>
    %160 = arith.mulf %158, %159 : vector<16x128xf32>
    %cst_89 = arith.constant 1.000000e+00 : f32
    %161 = vector.broadcast %cst_89 : f32 to vector<16x128xf32>
    %162 = arith.addf %161, %160 : vector<16x128xf32>
    %163 = vector.broadcast %157 : vector<16x1xf32> to vector<16x128xf32>
    %164 = arith.mulf %162, %163 : vector<16x128xf32>
    %165 = math.tanh %164 : vector<16x128xf32>
    %cst_90 = arith.constant dense<0.000000e+00> : vector<16xf32>
    %166 = vector.multi_reduction <add>, %165, %cst_90 [1] : vector<16x128xf32> to vector<16xf32>
    %167 = vector.shape_cast %166 : vector<16xf32> to vector<16x1xf32>
    %cst_91 = arith.constant 5.000000e-01 : f32
    %168 = vector.broadcast %cst_91 : f32 to vector<16x1xf32>
    %169 = arith.mulf %168, %167 : vector<16x1xf32>
    %cst_92 = arith.constant 6.400000e+01 : f32
    %170 = vector.broadcast %cst_92 : f32 to vector<16x1xf32>
    %171 = arith.subf %170, %169 : vector<16x1xf32>
    %c0_93 = arith.constant 0 : index
    %c0_94 = arith.constant 0 : index
    %172 = vector.load %arg4[%c0_93, %c0_94] : memref<16x3xf32, #tpu.memory_space<vmem>>, vector<16x3xf32>
    %173 = vector.broadcast %171 : vector<16x1xf32> to vector<16x3xf32>
    %174 = arith.mulf %173, %172 : vector<16x3xf32>
    %cst_95 = arith.constant dense<0.000000e+00> : vector<3xf32>
    %175 = vector.multi_reduction <add>, %174, %cst_95 [0] : vector<16x3xf32> to vector<3xf32>
    %176 = vector.shape_cast %175 : vector<3xf32> to vector<1x3xf32>
    %c7_96 = arith.constant 7 : index
    %c0_97 = arith.constant 0 : index
    %177 = vector.load %arg5[%c7_96, %c0_97] : memref<8x3xf32, #tpu.memory_space<vmem>>, vector<1x3xf32>
    tpu.vector_store %arg5[%c7_96, %c0_97], %176 {strides = array<i32>} : memref<8x3xf32, #tpu.memory_space<vmem>>, vector<1x3xf32>,
    return
  }
  func.func @transform_0(%arg0: i32) -> (i32, i32) {
    %c0_i32 = arith.constant 0 : i32
    %c0_i32_0 = arith.constant 0 : i32
    %c0_i32_1 = arith.constant 0 : i32
    return %c0_i32, %c0_i32_0 : i32, i32
  }
  func.func @transform_1(%arg0: i32) -> (i32, i32) {
    %c0_i32 = arith.constant 0 : i32
    %c0_i32_0 = arith.constant 0 : i32
    return %arg0, %c0_i32 : i32, i32
  }
  func.func @transform_2(%arg0: i32) -> (i32, i32, i32) {
    %c0_i32 = arith.constant 0 : i32
    %c0_i32_0 = arith.constant 0 : i32
    %c0_i32_1 = arith.constant 0 : i32
    return %arg0, %c0_i32, %c0_i32_0 : i32, i32, i32
  }
  func.func @transform_3(%arg0: i32) -> (i32, i32) {
    %c0_i32 = arith.constant 0 : i32
    %c0_i32_0 = arith.constant 0 : i32
    %c0_i32_1 = arith.constant 0 : i32
    return %c0_i32, %c0_i32_0 : i32, i32
  }
  func.func @transform_4(%arg0: i32) -> (i32, i32) {
    %c0_i32 = arith.constant 0 : i32
    %c0_i32_0 = arith.constant 0 : i32
    return %arg0, %c0_i32 : i32, i32
  }
}

</mosaic_0001>

<bundles_post_ra>
// kernel: gauc_loss.1
= control target key start
LH: loop header
LB: loop body
LE: loop exit
PB: predicated region body
PF: predicated region fallthrough
CT: control target
= control target key end

     0   :  { %s743_s15 = smov 0   ;;  %s887_s0 = inlined_call_operand.vmem [shape: f32[16,128], index: 0, kind: input, shape index: {}]   ;;  %s888_s1 = inlined_call_operand.vmem [shape: f32[16,128], index: 1, kind: input, shape index: {}]   ;;  %s889_s2 = inlined_call_operand.vmem [shape: f32[2,16,8], index: 2, kind: input, shape index: {}]   ;;  %s890_s3 = inlined_call_operand.vmem [shape: f32[16,3], index: 3, kind: input, shape index: {}]   ;;  %s891_s4 = inlined_call_operand.vmem [shape: f32[16,3], index: 4, kind: output, shape index: {}]  }
   0x1 LB: > { %s620_s16 = sadd.s32 4294967295, %s708_s15   ;;  %p624_p0 = scmp.ge.s32.totalorder %s708_s15, 1  ;;  %s708_s15 = sphi %s743_s15, %s14_s15  }
   0x2   : > { %p171_p1 = scmp.lt.s32.totalorder %s708_s15, 3 }
   0x4   : > { %p172_p2 = pnand %p624_p0, %p171_p1 }
   0x5   : > { %p200_p3 = scmp.lt.s32.totalorder (!%p172_p2), %s620_s16, 1 }
   0x6   : > { %175 = sbr.rel (%p172_p2) target bundleno = 466 (0x1d2), region = 36 }
   0xb   : > { %v710_v0 = vmov 0   ;;  %v711_v1 = vmov 1   ;;  %s893_s16 = smov (!%p200_p3, %s620_s16), 1  ;;  %v712_v2 = vmov 2   ;;  %v713_v5 = vmov 4   ;;  %v783_v8 = vld [vmem:[%s887_s0] sm:$0xff] }
   0xc   : > { %648 = vset.pattern.permute.xlu0 %v710_v0  ;;  %649 = vset.pattern.permute.xlu2 %v711_v1  ;;  %s631_s17 = sshll.u32 %s893_s16, 4  ;;  %s625_s18 = sshll.u32 %s893_s16, 3  ;;  %v714_v6 = vmov 3   ;;  %v793_v24 = vld [vmem:[%s887_s0 + $0x8] sm:$0xff]  ;;  %v715_v46 = vmov 5   ;;  %v716_v47 = vmov 6  }
   0xd   : > { %651 = vset.pattern.permute.xlu1 %v712_v2  ;;  %s208_s21 = scalar_lea.vmem %s889_s2, %s631_s17  ;;  %s767_s24 = scalar_lea.vmem %s888_s1, %s625_s18  ;;  %v717_v57 = vmov 7   ;;  %vm249_vm0 = vcmask 23552   ;;  %vm259_vm1 = vcmask 16384  }
   0xe   : > { %v758_v3 = vld [vmem:[%s208_s21] sm:$0xff]  ;;  %v760_v4 = vld [vmem:[%s208_s21 + $0x8] sm:$0xff]  ;;  %s837_s9 = scalar_lea.vmem %s891_s4, %s625_s18 }
   0xf   : > { %225 = vperm.xlu0 %648, %v758_v3   ;;  %270 = vperm.xlu2 %649, %v758_v3   ;;  %v662_v7 = vld [vmem:[%s767_s24 + $0x1] ss:$0 sm:$0xff]  ;;  %v664_v13 = vld [vmem:[%s767_s24 + $0x2] ss:$0 sm:$0xff]  ;;  %v663_v17 = vld [vmem:[%s767_s24] ss:$0 sm:$0xff] }
  0x10   : > { %316 = vperm.xlu1 %651, %v760_v4   ;;  %v265_v9 = vmul.f32 %v662_v7, %v783_v8  ;;  %v307_v16 = vmul.f32 %v664_v13, %v783_v8  ;;  %v219_v19 = vmul.f32 %v663_v17, %v783_v8  ;;  %v220_v26 = vmul.f32 %v663_v17, %v793_v24  ;;  %v665_v29 = vld [vmem:[%s767_s24 + $0x3] ss:$0 sm:$0xff]  ;;  %v666_v39 = vld [vmem:[%s767_s24 + $0x4] ss:$0 sm:$0xff]  ;;  %v667_v17 = vld [vmem:[%s767_s24 + $0x5] ss:$0 sm:$0xff] }
  0x11   : > { %v266_v30 = vmul.f32 %v662_v7, %v793_v24  ;;  %v349_v34 = vmul.f32 %v665_v29, %v783_v8  ;;  %v308_v36 = vmul.f32 %v664_v13, %v793_v24  ;;  %v391_v45 = vmul.f32 %v666_v39, %v783_v8 }
  0x12   : > { %v267_v10 = vadd.f32 1.0, %v265_v9  ;;  %v309_v18 = vadd.f32 1.0, %v307_v16  ;;  %v221_v22 = vadd.f32 1.0, %v219_v19  ;;  %v222_v28 = vadd.f32 1.0, %v220_v26 }
  0x13   : > { %v268_v35 = vadd.f32 1.0, %v266_v30  ;;  %v351_v37 = vadd.f32 1.0, %v349_v34  ;;  %v310_v42 = vadd.f32 1.0, %v308_v36  ;;  %v350_v49 = vmul.f32 %v665_v29, %v793_v24 }
  0x14   : > { %v393_v50 = vadd.f32 1.0, %v391_v45  ;;  %v392_v59 = vmul.f32 %v666_v39, %v793_v24 }
  0x15   : > { %v352_v52 = vadd.f32 1.0, %v350_v49 }
  0x16   : > { %v394_v61 = vadd.f32 1.0, %v392_v59 }
  0x17   : > { %230 = vperm.xlu0 %648, %v760_v4   ;;  %274 = vperm.xlu2 %649, %v760_v4  }
  0x18   : > { %655 = vset.pattern.permute.xlu1 %v713_v5 }
  0x19   : > { %400 = vperm.xlu1 %655, %v760_v4  }
  0x1f   : > { %652 = vset.pattern.permute.xlu0 %v714_v6  ;;  %650 = vset.pattern.permute.xlu2 %v712_v2 }
  0x20   : > { %354 = vperm.xlu0 %652, %v758_v3   ;;  %312 = vperm.xlu2 %650, %v758_v3  }
  0x21   : > { %659 = vset.pattern.permute.xlu1 %v717_v57 }
  0x28   : > { %654 = vset.pattern.permute.xlu0 %v713_v5  ;;  %653 = vset.pattern.permute.xlu2 %v714_v6 }
  0x29   : > { %396 = vperm.xlu0 %654, %v758_v3   ;;  %358 = vperm.xlu2 %653, %v760_v4  }
  0x31   : > { %656 = vset.pattern.permute.xlu2 %v715_v46  ;;  %657 = vset.pattern.permute.xlu0 %v716_v47 }
  0x69   : > { %v271_v11 = vpop.permute.xlu2 %270 }
  0x6a   : > { %v277_v12 = vmul.f32 %v271_v11, %v267_v10  ;;  %v813_v10 = vld [vmem:[%s890_s3] sm:$0xff] }
  0x6c   : > { %670 = vtanh.f32 %v277_v12 }
  0x71   : > { %v275_v14 = vpop.permute.xlu2 %274 }
  0x72   : > { %v671_v15 = vpop.eup %670  ;;  %v278_v38 = vmul.f32 %v275_v14, %v268_v35 }
  0x73   : > { %281 = vadd.xlane.f32.xlu0 %v671_v15 }
  0x7a   : > { %v313_v20 = vpop.permute.xlu2 %312 }
  0x7b   : > { %v319_v21 = vmul.f32 %v313_v20, %v309_v18 }
  0x7d   : > { %672 = vtanh.f32 %v319_v21 }
  0x81   : > { %v226_v23 = vpop.permute.xlu0 %225 }
  0x82   : > { %v233_v25 = vmul.f32 %v226_v23, %v221_v22  ;;  %v317_v44 = vpop.permute.xlu1 %316 }
  0x83   : > { %v673_v27 = vpop.eup %672  ;;  %v320_v48 = vmul.f32 %v317_v44, %v310_v42  ;;  %v359_v55 = vpop.permute.xlu2 %358 }
  0x84   : > { %674 = vtanh.f32 %v233_v25  ;;  %323 = vadd.xlane.f32.xlu2 %v673_v27  ;;  %v362_v58 = vmul.f32 %v359_v55, %v352_v52 }
  0x89   : > { %v231_v31 = vpop.permute.xlu0 %230 }
  0x8a   : > { %v675_v32 = vpop.eup %674  ;;  %v234_v33 = vmul.f32 %v231_v31, %v222_v28  ;;  %v433_v28 = vmul.f32 %v667_v17, %v783_v8 }
  0x8b   : > { %237 = vadd.xlane.f32.xlu1 %v675_v32  ;;  %v401_v62 = vpop.permute.xlu1 %400 }
  0x8c   : > { %676 = vtanh.f32 %v234_v33  ;;  %v404_v0 = vmul.f32 %v401_v62, %v394_v61  ;;  %v435_v35 = vadd.f32 1.0, %v433_v28 }
  0x8d   : > { %678 = vtanh.f32 %v278_v38 }
  0x92   : > { %v677_v40 = vpop.eup %676  ;;  %v355_v41 = vpop.permute.xlu0 %354 }
  0x93   : > { %v361_v43 = vmul.f32 %v355_v41, %v351_v37  ;;  %239 = vadd.xlane.f32.xlu1 %v677_v40  ;;  %v679_v51 = vpop.eup %678 }
  0x95   : > { %680 = vtanh.f32 %v361_v43 }
  0x96   : > { %682 = vtanh.f32 %v320_v48  ;;  %v434_v48 = vmul.f32 %v667_v17, %v793_v24 }
  0x9b   : > { %v681_v53 = vpop.eup %680  ;;  %283 = vadd.xlane.f32.xlu1 %v679_v51  ;;  %v397_v54 = vpop.permute.xlu0 %396 }
  0x9c   : > { %365 = vadd.xlane.f32.xlu2 %v681_v53  ;;  %v403_v56 = vmul.f32 %v397_v54, %v393_v50  ;;  %v683_v60 = vpop.eup %682 }
  0x9e   : > { %684 = vtanh.f32 %v403_v56  ;;  %v436_v56 = vadd.f32 1.0, %v434_v48 }
  0x9f   : > { %686 = vtanh.f32 %v362_v58  ;;  %v668_v58 = vld [vmem:[%s767_s24 + $0x6] ss:$0 sm:$0xff] }
  0xa0   : > { %688 = vtanh.f32 %v404_v0  ;;  %v475_v17 = vmul.f32 %v668_v58, %v783_v8 }
  0xa3   : > { %325 = vadd.xlane.f32.xlu1 %v683_v60 }
  0xa4   : > { %v685_v63 = vpop.eup %684 }
  0xa5   : > { %407 = vadd.xlane.f32.xlu0 %v685_v63  ;;  %v687_v1 = vpop.eup %686 }
  0xa6   : > { %v689_v2 = vpop.eup %688 }
  0xab   : > { %367 = vadd.xlane.f32.xlu1 %v687_v1 }
  0xb3   : > { %409 = vadd.xlane.f32.xlu1 %v689_v2 }
  0xb4   : > { %438 = vperm.xlu2 %656, %v758_v3  }
  0xb9   : > { %480 = vperm.xlu0 %657, %v758_v3  }
  0xbc   : > { %442 = vperm.xlu2 %656, %v760_v4  }
  0xc1   : > { %661 = vset.pattern.permute.xlu0 %v717_v57 }
  0xc4   : > { %658 = vset.pattern.permute.xlu2 %v716_v47 }
  0xc5   : > { %484 = vperm.xlu2 %658, %v760_v4  }
  0xcc   : > { %522 = vperm.xlu1 %659, %v758_v3   ;;  %v818_v3 = vld [vmem:[%s890_s3 + $0x8] sm:$0xff] }
  0xcd   : > { %660 = vset.pattern.permute.xlu2 %v717_v57 }
  0xce   : > { %526 = vperm.xlu2 %660, %v760_v4  }
  0xe6   : > { %v282_v11 = vpop.xlane.xlu0 %281 }
  0xe7   : > { %v285_v4 = vmul.f32 0.5, %v282_v11  ;;  %v476_v11 = vmul.f32 %v668_v58, %v793_v24 }
  0xe9   : > { %v287_v19 = vsub.f32 64.0, %v285_v4 }
  0xeb   : > { %v291_v29 = vmul.f32 %v287_v19, %v813_v10  ;;  %v478_v19 = vadd.f32 1.0, %v476_v11 }
  0xed   : > { %v293_v36 = vsel %vm249_vm0, %v291_v29, 0.0  ;;  %v477_v29 = vadd.f32 1.0, %v475_v17 }
  0xf7   : > { %v324_v9 = vpop.xlane.xlu2 %323 }
  0xf8   : > { %v327_v23 = vmul.f32 0.5, %v324_v9 }
  0xfa   : > { %v329_v32 = vsub.f32 64.0, %v327_v23 }
  0xfc   : > { %v333_v41 = vmul.f32 %v329_v32, %v813_v10 }
  0xfe   : > { %v238_v5 = vpop.xlane.xlu1 %237  ;;  %v335_v52 = vsel %vm249_vm0, %v333_v41, 0.0 }
  0xff   : > { %v241_v6 = vmul.f32 0.5, %v238_v5 }
 0x101   : > { %v243_v7 = vsub.f32 64.0, %v241_v6 }
 0x103   : > { %v247_v14 = vmul.f32 %v813_v10, %v243_v7 }
 0x105   : > { %v250_v18 = vsel %vm249_vm0, %v247_v14, 0.0 }
 0x106   : > { %v240_v12 = vpop.xlane.xlu1 %239 }
 0x107   : > { %v242_v13 = vmul.f32 0.5, %v240_v12 }
 0x109   : > { %v244_v15 = vsub.f32 64.0, %v242_v13 }
 0x10b   : > { %v248_v16 = vmul.f32 %v818_v3, %v244_v15 }
 0x10d   : > { %v251_v20 = vsel %vm249_vm0, %v248_v16, 0.0 }
 0x10e   : > { %v252_v21 = vadd.f32 %v251_v20, %v250_v18  ;;  %v284_v22 = vpop.xlane.xlu1 %283  ;;  %v669_v20 = vld [vmem:[%s767_s24 + $0x7] ss:$0 sm:$0xff] }
 0x10f   : > { %v286_v25 = vmul.f32 0.5, %v284_v22  ;;  %v366_v26 = vpop.xlane.xlu2 %365 }
 0x110   : > { %v253_v27 = vrot.slane %v252_v21, 4  ;;  %v369_v42 = vmul.f32 0.5, %v366_v26 }
 0x111   : > { %v288_v30 = vsub.f32 64.0, %v286_v25 }
 0x112   : > { %v254_v31 = vadd.f32 %v253_v27, %v252_v21  ;;  %v371_v53 = vsub.f32 64.0, %v369_v42 }
 0x113   : > { %v292_v33 = vmul.f32 %v288_v30, %v818_v3 }
 0x114   : > { %v255_v34 = vrot.slane %v254_v31, 2  ;;  %v375_v63 = vmul.f32 %v371_v53, %v813_v10 }
 0x115   : > { %v294_v37 = vsel %vm249_vm0, %v292_v33, 0.0 }
 0x116   : > { %v256_v38 = vadd.f32 %v255_v34, %v254_v31  ;;  %v295_v39 = vadd.f32 %v294_v37, %v293_v36  ;;  %v326_v40 = vpop.xlane.xlu1 %325  ;;  %v377_v4 = vsel %vm249_vm0, %v375_v63, 0.0  ;;  %v518_v34 = vmul.f32 %v669_v20, %v793_v24 }
 0x117   : > { %v328_v43 = vmul.f32 0.5, %v326_v40  ;;  %v439_v44 = vpop.permute.xlu2 %438 }
 0x118   : > { %v257_v45 = vrot.slane %v256_v38, 1  ;;  %v296_v46 = vrot.slane %v295_v39, 4  ;;  %v445_v47 = vmul.f32 %v439_v44, %v435_v35  ;;  %v408_v57 = vpop.xlane.xlu0 %407 }
 0x119   : > { %v330_v49 = vsub.f32 64.0, %v328_v43  ;;  %v411_v2 = vmul.f32 0.5, %v408_v57  ;;  %v520_v43 = vadd.f32 1.0, %v518_v34 }
 0x11a   : > { %v258_v50 = vadd.f32 %v257_v45, %v256_v38  ;;  %v297_v51 = vadd.f32 %v296_v46, %v295_v39  ;;  %690 = vtanh.f32 %v445_v47 }
 0x11b   : > { %v334_v54 = vmul.f32 %v330_v49, %v818_v3  ;;  %v413_v16 = vsub.f32 64.0, %v411_v2 }
 0x11c   : > { %260 = vst.msk [vmem:[%s837_s9] sm:$0x1] %vm259_vm1, %v258_v50  ;;  %v298_v55 = vrot.slane %v297_v51, 2 }
 0x11d   : > { %v336_v59 = vsel %vm249_vm0, %v334_v54, 0.0  ;;  %v417_v26 = vmul.f32 %v413_v16, %v813_v10 }
 0x11e   : > { %v299_v60 = vadd.f32 %v298_v55, %v297_v51  ;;  %v337_v61 = vadd.f32 %v336_v59, %v335_v52  ;;  %v368_v62 = vpop.xlane.xlu1 %367 }
 0x11f   : > { %v370_v0 = vmul.f32 0.5, %v368_v62  ;;  %v443_v1 = vpop.permute.xlu2 %442  ;;  %v419_v38 = vsel %vm249_vm0, %v417_v26, 0.0 }
 0x120   : > { %v691_v5 = vpop.eup %690  ;;  %v300_v6 = vrot.slane %v299_v60, 1  ;;  %v338_v7 = vrot.slane %v337_v61, 4  ;;  %v446_v9 = vmul.f32 %v443_v1, %v436_v56  ;;  %v517_v56 = vmul.f32 %v669_v20, %v783_v8 }
 0x121   : > { %v372_v12 = vsub.f32 64.0, %v370_v0  ;;  %449 = vadd.xlane.f32.xlu2 %v691_v5 }
 0x122   : > { %v301_v13 = vadd.f32 %v300_v6, %v299_v60  ;;  %v339_v14 = vadd.f32 %v338_v7, %v337_v61  ;;  %692 = vtanh.f32 %v446_v9  ;;  %v519_v60 = vadd.f32 1.0, %v517_v56 }
 0x123   : > { %v376_v15 = vmul.f32 %v372_v12, %v818_v3 }
 0x124   : > { %302 = vst.msk [vmem:[%s837_s9 + $0x1] sm:$0x1] %vm259_vm1, %v301_v13  ;;  %v340_v18 = vrot.slane %v339_v14, 2 }
 0x125   : > { %v378_v21 = vsel %vm249_vm0, %v376_v15, 0.0 }
 0x126   : > { %v341_v22 = vadd.f32 %v340_v18, %v339_v14  ;;  %v379_v23 = vadd.f32 %v378_v21, %v377_v4  ;;  %v410_v25 = vpop.xlane.xlu1 %409 }
 0x127   : > { %v412_v27 = vmul.f32 0.5, %v410_v25  ;;  %v485_v28 = vpop.permute.xlu2 %484 }
 0x128   : > { %v693_v30 = vpop.eup %692  ;;  %v342_v31 = vrot.slane %v341_v22, 1  ;;  %v380_v32 = vrot.slane %v379_v23, 4  ;;  %v488_v33 = vmul.f32 %v485_v28, %v478_v19 }
 0x129   : > { %v414_v35 = vsub.f32 64.0, %v412_v27  ;;  %451 = vadd.xlane.f32.xlu1 %v693_v30 }
 0x12a   : > { %v343_v36 = vadd.f32 %v342_v31, %v341_v22  ;;  %v381_v37 = vadd.f32 %v380_v32, %v379_v23  ;;  %694 = vtanh.f32 %v488_v33 }
 0x12b   : > { %v418_v39 = vmul.f32 %v414_v35, %v818_v3  ;;  %v481_v40 = vpop.permute.xlu0 %480 }
 0x12c   : > { %344 = vst.msk [vmem:[%s837_s9 + $0x2] sm:$0x1] %vm259_vm1, %v343_v36  ;;  %v382_v41 = vrot.slane %v381_v37, 2  ;;  %v487_v42 = vmul.f32 %v481_v40, %v477_v29 }
 0x12d   : > { %v420_v44 = vsel %vm249_vm0, %v418_v39, 0.0 }
 0x12e   : > { %v383_v45 = vadd.f32 %v382_v41, %v381_v37  ;;  %v421_v24 = vadd.f32 %v420_v44, %v419_v38  ;;  %696 = vtanh.f32 %v487_v42 }
 0x12f   : > { %v527_v46 = vpop.permute.xlu2 %526 }
 0x130   : > { %v695_v47 = vpop.eup %694  ;;  %v384_v48 = vrot.slane %v383_v45, 1  ;;  %v422_v49 = vrot.slane %v421_v24, 4  ;;  %v530_v50 = vmul.f32 %v527_v46, %v520_v43 }
 0x131   : > { %493 = vadd.xlane.f32.xlu2 %v695_v47 }
 0x132   : > { %v385_v51 = vadd.f32 %v384_v48, %v383_v45  ;;  %v423_v52 = vadd.f32 %v422_v49, %v421_v24  ;;  %698 = vtanh.f32 %v530_v50 }
 0x134   : > { %v697_v53 = vpop.eup %696  ;;  %386 = vst.msk [vmem:[%s837_s9 + $0x3] sm:$0x1] %vm259_vm1, %v385_v51  ;;  %v424_v54 = vrot.slane %v423_v52, 2 }
 0x135   : > { %491 = vadd.xlane.f32.xlu0 %v697_v53 }
 0x136   : > { %v425_v55 = vadd.f32 %v424_v54, %v423_v52 }
 0x138   : > { %v699_v57 = vpop.eup %698  ;;  %v426_v58 = vrot.slane %v425_v55, 1 }
 0x139   : > { %535 = vadd.xlane.f32.xlu1 %v699_v57 }
 0x13a   : > { %v427_v59 = vadd.f32 %v426_v58, %v425_v55 }
 0x13c   : > { %428 = vst.msk [vmem:[%s837_s9 + $0x4] sm:$0x1] %vm259_vm1, %v427_v59 }
 0x13e   : > { %v523_v61 = vpop.permute.xlu1 %522 }
 0x13f   : > { %v529_v62 = vmul.f32 %v523_v61, %v519_v60 }
 0x141   : > { %700 = vtanh.f32 %v529_v62 }
 0x147   : > { %v701_v63 = vpop.eup %700 }
 0x148   : > { %533 = vadd.xlane.f32.xlu2 %v701_v63 }
 0x194   : > { %v450_v0 = vpop.xlane.xlu2 %449 }
 0x195   : > { %v453_v1 = vmul.f32 0.5, %v450_v0 }
 0x197   : > { %v455_v2 = vsub.f32 64.0, %v453_v1 }
 0x199   : > { %v459_v6 = vmul.f32 %v455_v2, %v813_v10 }
 0x19b   : > { %v461_v9 = vsel %vm249_vm0, %v459_v6, 0.0 }
 0x19c   : > { %v452_v5 = vpop.xlane.xlu1 %451 }
 0x19d   : > { %v454_v7 = vmul.f32 0.5, %v452_v5 }
 0x19f   : > { %v456_v8 = vsub.f32 64.0, %v454_v7 }
 0x1a1   : > { %v460_v11 = vmul.f32 %v456_v8, %v818_v3 }
 0x1a3   : > { %v462_v12 = vsel %vm249_vm0, %v460_v11, 0.0 }
 0x1a4   : > { %v463_v13 = vadd.f32 %v462_v12, %v461_v9  ;;  %v494_v14 = vpop.xlane.xlu2 %493 }
 0x1a5   : > { %v496_v4 = vmul.f32 0.5, %v494_v14 }
 0x1a6   : > { %v464_v15 = vrot.slane %v463_v13, 4 }
 0x1a7   : > { %v498_v16 = vsub.f32 64.0, %v496_v4 }
 0x1a8   : > { %v465_v17 = vadd.f32 %v464_v15, %v463_v13  ;;  %v492_v18 = vpop.xlane.xlu0 %491 }
 0x1a9   : > { %v502_v19 = vmul.f32 %v498_v16, %v818_v3  ;;  %v495_v20 = vmul.f32 0.5, %v492_v18 }
 0x1aa   : > { %v466_v21 = vrot.slane %v465_v17, 2 }
 0x1ab   : > { %v497_v22 = vsub.f32 64.0, %v495_v20  ;;  %v504_v25 = vsel %vm249_vm0, %v502_v19, 0.0 }
 0x1ac   : > { %v467_v23 = vadd.f32 %v466_v21, %v465_v17  ;;  %v536_v31 = vpop.xlane.xlu1 %535 }
 0x1ad   : > { %v501_v26 = vmul.f32 %v497_v22, %v813_v10  ;;  %v538_v34 = vmul.f32 0.5, %v536_v31 }
 0x1ae   : > { %v468_v27 = vrot.slane %v467_v23, 1 }
 0x1af   : > { %v503_v28 = vsel %vm249_vm0, %v501_v26, 0.0  ;;  %v540_v37 = vsub.f32 64.0, %v538_v34 }
 0x1b0   : > { %v469_v29 = vadd.f32 %v468_v27, %v467_v23  ;;  %v505_v30 = vadd.f32 %v504_v25, %v503_v28 }
 0x1b1   : > { %v544_v42 = vmul.f32 %v540_v37, %v818_v3 }
 0x1b2   : > { %470 = vst.msk [vmem:[%s837_s9 + $0x5] sm:$0x1] %vm259_vm1, %v469_v29  ;;  %v506_v32 = vrot.slane %v505_v30, 4 }
 0x1b3   : > { %v546_v45 = vsel %vm249_vm0, %v544_v42, 0.0 }
 0x1b4   : > { %v507_v33 = vadd.f32 %v506_v32, %v505_v30 }
 0x1b6   : > { %v508_v35 = vrot.slane %v507_v33, 2 }
 0x1b8   : > { %v509_v36 = vadd.f32 %v508_v35, %v507_v33 }
 0x1ba   : > { %v510_v38 = vrot.slane %v509_v36, 1 }
 0x1bb   : > { %v534_v39 = vpop.xlane.xlu2 %533 }
 0x1bc   : > { %v511_v40 = vadd.f32 %v510_v38, %v509_v36  ;;  %v537_v41 = vmul.f32 0.5, %v534_v39 }
 0x1be   : > { %512 = vst.msk [vmem:[%s837_s9 + $0x6] sm:$0x1] %vm259_vm1, %v511_v40  ;;  %v539_v43 = vsub.f32 64.0, %v537_v41 }
 0x1c0   : > { %v543_v44 = vmul.f32 %v539_v43, %v813_v10 }
 0x1c2   : > { %v545_v24 = vsel %vm249_vm0, %v543_v44, 0.0 }
 0x1c3   : > { %v547_v46 = vadd.f32 %v546_v45, %v545_v24 }
 0x1c5   : > { %v548_v47 = vrot.slane %v547_v46, 4 }
 0x1c7   : > { %v549_v48 = vadd.f32 %v548_v47, %v547_v46 }
 0x1c9   : > { %v550_v49 = vrot.slane %v549_v48, 2 }
 0x1cb   : > { %v551_v50 = vadd.f32 %v550_v49, %v549_v48 }
 0x1cd   : > { %v552_v51 = vrot.slane %v551_v50, 1 }
 0x1cf   : > { %v553_v52 = vadd.f32 %v552_v51, %v551_v50 }
 0x1d1   : > { %554 = vst.msk [vmem:[%s837_s9 + $0x7] sm:$0x1] %vm259_vm1, %v553_v52 }
 0x1d2 PF: > { %s14_s15 = sadd.s32 1, %s708_s15  }
 0x1d3   : > { %p11_p4 = scmp.ge.s32.totalorder %s14_s15, 4  }
 0x1d5   :  { %13 = sbr.rel (!%p11_p4) target bundleno = 1 (0x1), region = 69 }

</bundles_post_ra>
